<compile_context>
chip_gen: v5e
topology: v5e:2x2
jax: 0.10.0
libtpu: 0.0.40
codegen_flags: <defaults>
</compile_context>

<pallas_src>
import functools

import jax
import jax.numpy as jnp
from jax import lax
from jax.experimental import pallas as pl
from jax.experimental.pallas import tpu as pltpu


def _make_conv_kernel(Nb, Hout, KH, WCin, WoCo, mm_precision):
    """Per-grid-step kernel: Nb batch elements, KH accumulating band matmuls."""

    def conv_kernel(x_ref, w_ref, b_ref, o_ref):
        # x_ref: (Nb, Hp, W*Cin)          H-wrapped rows, lane-dense columns
        # w_ref: (KH, W*Cin, Wout*Cout)   circulant band (W taps + W-wrap folded in)
        # b_ref: (1, Wout*Cout)
        # o_ref: (Nb, Hout, Wout*Cout)    lane-dense output
        M = Nb * Hout
        # Initialize the accumulator with the broadcast bias (hoisted, single op).
        acc = jnp.broadcast_to(b_ref[...].astype(jnp.float32), (M, WoCo))
        for kh in range(KH):                       # static, unrolled (KH == 3)
            taps = x_ref[:, kh:kh + Hout, :].reshape(M, WCin)
            acc = acc + jnp.dot(taps, w_ref[kh],
                                preferred_element_type=jnp.float32,
                                precision=mm_precision)
        o_ref[...] = acc.reshape(Nb, Hout, WoCo).astype(o_ref.dtype)

    return conv_kernel


def _banded_weight(weight, W, Wout, padding, dtype):
    """(Cout, Cin, KH, KW) -> circulant band (KH, W*Cin, Wout*Cout).

    band[kh, ((j+kw-padding) % W)*Cin + c, j*Cout + o] = weight[o, c, kh, kw]

    i.e. the KW width taps and the circular padding along W are folded into a
    banded/circulant matrix so the conv becomes row-slice @ band matmuls.
    Built with elementwise select+sum (no matmul) to keep weights exact f32.
    """
    Cout, Cin, KH, KW = weight.shape
    w_hkco = jnp.transpose(weight, (2, 3, 1, 0)).astype(jnp.float32)  # (KH,KW,Cin,Cout)
    j = jnp.arange(Wout)[:, None]
    kw = jnp.arange(KW)[None, :]
    src = (j + kw - padding) % W                                      # (Wout, KW)
    sel = (src[:, :, None] == jnp.arange(W)[None, None, :]).astype(jnp.float32)
    # prod axes: (KH, Wout, KW, W, Cin, Cout)
    prod = sel[None, :, :, :, None, None] * w_hkco[:, None, :, None, :, :]
    band = prod.sum(axis=2)                          # (KH, Wout, W, Cin, Cout)
    band = jnp.transpose(band, (0, 2, 3, 1, 4))      # (KH, W, Cin, Wout, Cout)
    return band.reshape(KH, W * Cin, Wout * Cout).astype(dtype)


def gconv2d_forward(x, weight, bias, *, G, padding=1, block_n=2,
                    precision="fp32"):
    """GConv2d.forward.

    x      : (B, G*Cin, H, W)    float32, NCHW
    weight : (Cout, Cin, KH, KW) (PyTorch Conv2d layout)
    bias   : (Cout,)
    returns: (B, G*Cout, Hout, Wout)
    """
    # TODO(synk): only stride=1 is implemented (the GConv2d default).
    B, GC, H, W = x.shape
    Cin = GC // G
    Cout, _, KH, KW = weight.shape
    N = B * G
    Hp = H + 2 * padding
    Hout = Hp - KH + 1
    Wout = W + 2 * padding - KW + 1

    Nb = block_n if (block_n > 0 and N % block_n == 0) else 1

    # ---- wrapper glue (one relayout pass in, one out) ----
    # Fold groups into batch; wrap-pad H only (the W wrap lives in the weight
    # band); present a lane-dense (N, Hp, W*Cin) view to the kernel.
    # TODO(synk): the NCHW <-> lane-dense transposes could be eliminated
    # entirely by keeping a channels-last layout in the surrounding model.
    xg = x.reshape(N, Cin, H, W)
    xh = jnp.concatenate(
        [xg[:, :, H - padding:, :], xg, xg[:, :, :padding, :]], axis=2)
    x2d = jnp.transpose(xh, (0, 2, 3, 1)).reshape(N, Hp, W * Cin)

    if precision == "bf16":
        compute_dtype = jnp.bfloat16
        mm_precision = lax.Precision.DEFAULT
    else:
        compute_dtype = jnp.float32
        mm_precision = lax.Precision.HIGHEST   # exact-f32 MXU passes
    x2d = x2d.astype(compute_dtype)
    w_band = _banded_weight(weight, W, Wout, padding, compute_dtype)
    b_row = jnp.tile(bias.astype(jnp.float32), Wout).reshape(1, Wout * Cout)

    WCin = W * Cin
    WoCo = Wout * Cout
    kernel = _make_conv_kernel(Nb, Hout, KH, WCin, WoCo, mm_precision)

    y_flat = pl.pallas_call(
        kernel,
        out_shape=jax.ShapeDtypeStruct((N, Hout, WoCo), jnp.float32),
        grid_spec=pl.GridSpec(
            grid=(N // Nb,),
            in_specs=[
                pl.BlockSpec((Nb, Hp, WCin), lambda n: (n, 0, 0)),
                # Constant index maps: weight/bias blocks stay VMEM-resident.
                pl.BlockSpec((KH, WCin, WoCo), lambda n: (0, 0, 0)),
                pl.BlockSpec((1, WoCo), lambda n: (0, 0)),
            ],
            out_specs=pl.BlockSpec((Nb, Hout, WoCo), lambda n: (n, 0, 0)),
        ),
        compiler_params=pltpu.CompilerParams(
            dimension_semantics=("parallel",)),
    )(x2d, w_band, b_row)

    # ---- glue: lane-dense -> NCHW, unfold groups back into channels ----
    y = y_flat.reshape(N, Hout, Wout, Cout)
    y = jnp.transpose(y, (0, 3, 1, 2))               # (N, Cout, Hout, Wout)
    return y.reshape(B, G * Cout, Hout, Wout)


def _reference(x, weight, bias, *, G, padding=1):
    """Pure-JAX reference (lax.conv_general_dilated) for correctness check."""
    B, GC, H, W = x.shape
    Cin = GC // G
    Cout = weight.shape[0]
    xg = x.reshape(B * G, Cin, H, W)
    xp = jnp.pad(
        xg, ((0, 0), (0, 0), (padding, padding), (padding, padding)),
        mode="wrap")
    y = lax.conv_general_dilated(
        xp, weight, window_strides=(1, 1), padding="VALID",
        dimension_numbers=("NCHW", "OIHW", "NCHW"),
        precision=lax.Precision.HIGHEST)
    y = y + bias[None, :, None, None]
    return y.reshape(B, G * Cout, *y.shape[2:])


if __name__ == "__main__":
    # Small shapes consistent with the module: G=2, per-group in_ch=4, out_ch=8.
    B, G, Cin, Cout, H, W, K = 2, 2, 4, 8, 16, 16, 3

    key = jax.random.PRNGKey(0)
    kx, kwk, kb = jax.random.split(key, 3)
    x = jax.random.normal(kx, (B, G * Cin, H, W), dtype=jnp.float32)
    fan_in = Cin * K * K
    weight = jax.random.normal(kwk, (Cout, Cin, K, K), dtype=jnp.float32)
    weight = weight * (1.0 / jnp.sqrt(fan_in))
    bias = jax.random.normal(kb, (Cout,), dtype=jnp.float32) * 0.1

    fwd = jax.jit(functools.partial(gconv2d_forward, G=G, padding=1))
    y = fwd(x, weight, bias)
    y = jax.block_until_ready(y)

    y_ref = _reference(x, weight, bias, G=G, padding=1)
    assert y.shape == (B, G * Cout, H, W), y.shape
    err = float(jnp.max(jnp.abs(y - y_ref)))
    assert jnp.allclose(y, y_ref, atol=2e-3, rtol=2e-3), err

    print("KERNEL_OK")
</pallas_src>

<mosaic_0001>
module attributes {stable_mosaic.version = 11 : i64} {
  func.func @conv_kernel(%arg0: i32, %arg1: memref<2x18x64xf32, #tpu.memory_space<vmem>>, %arg2: memref<3x64x128xf32, #tpu.memory_space<vmem>>, %arg3: memref<1x128xf32, #tpu.memory_space<vmem>>, %arg4: memref<2x16x128xf32, #tpu.memory_space<vmem>>) attributes {dimension_semantics = [#tpu.dimension_semantics<parallel>], iteration_bounds = array<i64: 2>, scalar_prefetch = 0 : i64, scratch_operands = 0 : i64, tpu.core_type = #tpu.core_type<tc>, window_params = [{transform_indices = @transform_0, window_bounds = array<i64: 2, 18, 64>}, {pipeline_mode = #tpu.pipeline_mode<synchronous>, transform_indices = @transform_1, window_bounds = array<i64: 3, 64, 128>}, {pipeline_mode = #tpu.pipeline_mode<synchronous>, transform_indices = @transform_2, window_bounds = array<i64: 1, 128>}, {transform_indices = @transform_3, window_bounds = array<i64: 2, 16, 128>}]} {
    %c0 = arith.constant 0 : index
    %c0_0 = arith.constant 0 : index
    %0 = vector.load %arg3[%c0, %c0_0] : memref<1x128xf32, #tpu.memory_space<vmem>>, vector<1x128xf32>
    %1 = vector.shape_cast %0 : vector<1x128xf32> to vector<1x128xf32>
    %2 = vector.broadcast %1 : vector<1x128xf32> to vector<32x128xf32>
    %c0_1 = arith.constant 0 : index
    %c0_2 = arith.constant 0 : index
    %c0_3 = arith.constant 0 : index
    %3 = vector.load %arg1[%c0_1, %c0_2, %c0_3] : memref<2x18x64xf32, #tpu.memory_space<vmem>>, vector<2x16x64xf32>
    %4 = vector.shape_cast %3 : vector<2x16x64xf32> to vector<32x64xf32>
    %c0_4 = arith.constant 0 : index
    %c0_5 = arith.constant 0 : index
    %c0_6 = arith.constant 0 : index
    %5 = vector.load %arg2[%c0_4, %c0_5, %c0_6] : memref<3x64x128xf32, #tpu.memory_space<vmem>>, vector<1x64x128xf32>
    %6 = vector.shape_cast %5 : vector<1x64x128xf32> to vector<64x128xf32>
    %cst = arith.constant dense<0.000000e+00> : vector<32x128xf32>
    %7 = tpu.matmul %4, %6, %cst {dimension_numbers = #tpu.dot_dimension_numbers<[1], [0], [0], [1], [0, 0, 1, 1], [], []>, precision = #tpu.contract_precision<fp32>} : vector<32x64xf32>, vector<64x128xf32>, vector<32x128xf32> -> vector<32x128xf32>
    %8 = arith.addf %2, %7 : vector<32x128xf32>
    %c0_7 = arith.constant 0 : index
    %c1 = arith.constant 1 : index
    %c0_8 = arith.constant 0 : index
    %9 = vector.load %arg1[%c0_7, %c1, %c0_8] : memref<2x18x64xf32, #tpu.memory_space<vmem>>, vector<2x16x64xf32>
    %10 = vector.shape_cast %9 : vector<2x16x64xf32> to vector<32x64xf32>
    %c1_9 = arith.constant 1 : index
    %c0_10 = arith.constant 0 : index
    %c0_11 = arith.constant 0 : index
    %11 = vector.load %arg2[%c1_9, %c0_10, %c0_11] : memref<3x64x128xf32, #tpu.memory_space<vmem>>, vector<1x64x128xf32>
    %12 = vector.shape_cast %11 : vector<1x64x128xf32> to vector<64x128xf32>
    %cst_12 = arith.constant dense<0.000000e+00> : vector<32x128xf32>
    %13 = tpu.matmul %10, %12, %cst_12 {dimension_numbers = #tpu.dot_dimension_numbers<[1], [0], [0], [1], [0, 0, 1, 1], [], []>, precision = #tpu.contract_precision<fp32>} : vector<32x64xf32>, vector<64x128xf32>, vector<32x128xf32> -> vector<32x128xf32>
    %14 = arith.addf %8, %13 : vector<32x128xf32>
    %c0_13 = arith.constant 0 : index
    %c2 = arith.constant 2 : index
    %c0_14 = arith.constant 0 : index
    %15 = vector.load %arg1[%c0_13, %c2, %c0_14] : memref<2x18x64xf32, #tpu.memory_space<vmem>>, vector<2x16x64xf32>
    %16 = vector.shape_cast %15 : vector<2x16x64xf32> to vector<32x64xf32>
    %c2_15 = arith.constant 2 : index
    %c0_16 = arith.constant 0 : index
    %c0_17 = arith.constant 0 : index
    %17 = vector.load %arg2[%c2_15, %c0_16, %c0_17] : memref<3x64x128xf32, #tpu.memory_space<vmem>>, vector<1x64x128xf32>
    %18 = vector.shape_cast %17 : vector<1x64x128xf32> to vector<64x128xf32>
    %cst_18 = arith.constant dense<0.000000e+00> : vector<32x128xf32>
    %19 = tpu.matmul %16, %18, %cst_18 {dimension_numbers = #tpu.dot_dimension_numbers<[1], [0], [0], [1], [0, 0, 1, 1], [], []>, precision = #tpu.contract_precision<fp32>} : vector<32x64xf32>, vector<64x128xf32>, vector<32x128xf32> -> vector<32x128xf32>
    %20 = arith.addf %14, %19 : vector<32x128xf32>
    %21 = vector.shape_cast %20 : vector<32x128xf32> to vector<2x16x128xf32>
    %c0_19 = arith.constant 0 : index
    %c0_20 = arith.constant 0 : index
    %c0_21 = arith.constant 0 : index
    %22 = vector.load %arg4[%c0_19, %c0_20, %c0_21] : memref<2x16x128xf32, #tpu.memory_space<vmem>>, vector<2x16x128xf32>
    tpu.vector_store %arg4[%c0_19, %c0_20, %c0_21], %21 {strides = array<i32>} : memref<2x16x128xf32, #tpu.memory_space<vmem>>, vector<2x16x128xf32>,
    return
  }
  func.func @transform_0(%arg0: i32) -> (i32, i32, i32) {
    %c0_i32 = arith.constant 0 : i32
    %c0_i32_0 = arith.constant 0 : i32
    %c0_i32_1 = arith.constant 0 : i32
    return %arg0, %c0_i32, %c0_i32_0 : i32, i32, i32
  }
  func.func @transform_1(%arg0: i32) -> (i32, i32, i32) {
    %c0_i32 = arith.constant 0 : i32
    %c0_i32_0 = arith.constant 0 : i32
    %c0_i32_1 = arith.constant 0 : i32
    %c0_i32_2 = arith.constant 0 : i32
    return %c0_i32, %c0_i32_0, %c0_i32_1 : i32, i32, i32
  }
  func.func @transform_2(%arg0: i32) -> (i32, i32) {
    %c0_i32 = arith.constant 0 : i32
    %c0_i32_0 = arith.constant 0 : i32
    %c0_i32_1 = arith.constant 0 : i32
    return %c0_i32, %c0_i32_0 : i32, i32
  }
  func.func @transform_3(%arg0: i32) -> (i32, i32, i32) {
    %c0_i32 = arith.constant 0 : i32
    %c0_i32_0 = arith.constant 0 : i32
    %c0_i32_1 = arith.constant 0 : i32
    return %arg0, %c0_i32, %c0_i32_0 : i32, i32, i32
  }
}

</mosaic_0001>

<bundles_post_ra>
// kernel: tile.8
= control target key start
LH: loop header
LB: loop body
LE: loop exit
PB: predicated region body
PF: predicated region fallthrough
CT: control target
= control target key end

     0   :  { %s28_s0 = inlined_call_operand.vmem [shape: f32[8], index: 0, kind: input, shape index: {}]   ;;  %s29_s1 = inlined_call_operand.vmem [shape: f32[16,8], index: 1, kind: output, shape index: {}]  }
   0x1   :  { %v4_v0 = vld [vmem:[%s28_s0] ss:$0 sm:$0xff] }
   0x2   :  { %5 = vst [vmem:[%s29_s1] sm:$0xff] %v4_v0 }
   0x3   :  { %8 = vst [vmem:[%s29_s1 + $0x8] sm:$0xff] %v4_v0 }

// kernel: tile.9
= control target key start
LH: loop header
LB: loop body
LE: loop exit
PB: predicated region body
PF: predicated region fallthrough
CT: control target
= control target key end

     0   :  { %s131_s10 = smov 120   ;;  %s132_s11 = smov 104   ;;  %vm3_vm0 = vcmask 64512   ;;  %vm9_vm1 = vcmask 1048512   ;;  %vm15_vm2 = vcmask 982912   ;;  %vm21_vm3 = vcmask 917312   ;;  %s207_s0 = inlined_call_operand.vmem [shape: f32[16,8], index: 0, kind: input, shape index: {}]   ;;  %s208_s1 = inlined_call_operand.vmem [shape: f32[1,128], index: 1, kind: output, shape index: {}]  }
   0x1   :  { %v101_v0 = vld [vmem:[%s207_s0 + $0xf] sm:$0x1]   ;;  %v103_v1 = vld [vmem:[%s207_s0 + $0xd] sm:$0x1]   ;;  %v105_v2 = vld [vmem:[%s207_s0 + $0xb] sm:$0x1]  }
   0x2   :  { %7 = vrot.lane.b32.xlu0 %v101_v0, %s131_s10  ;;  %19 = vrot.lane.b32.xlu1 %v103_v1, %s132_s11  ;;  %s133_s14 = smov 88   ;;  %v102_v3 = vld [vmem:[%s207_s0 + $0xe] sm:$0x1]   ;;  %v104_v4 = vld [vmem:[%s207_s0 + $0xc] sm:$0x1]   ;;  %s134_s19 = smov 112  }
   0x3   :  { %31 = vrot.lane.b32.xlu2 %v105_v2, %s133_s14  ;;  %s135_s20 = smov 96   ;;  %v106_v5 = vld [vmem:[%s207_s0 + $0xa] sm:$0x1]   ;;  %s136_s23 = smov 80   ;;  %v107_v6 = vld [vmem:[%s207_s0 + $0x9] sm:$0x1]  }
   0x4   :  { %v108_v7 = vld [vmem:[%s207_s0 + $0x8] sm:$0x1]   ;;  %s137_s28 = smov 72   ;;  %s138_s29 = smov 64   ;;  %v109_v8 = vld [vmem:[%s207_s0 + $0x7] sm:$0x1]  }
   0x5   :  { %s139_s3 = smov 56   ;;  %v110_v9 = vld [vmem:[%s207_s0 + $0x6] sm:$0x1]   ;;  %v111_v10 = vld [vmem:[%s207_s0 + $0x5] sm:$0x1]   ;;  %s140_s8 = smov 48  }
   0x6   :  { %s141_s9 = smov 40   ;;  %v112_v11 = vld [vmem:[%s207_s0 + $0x4] sm:$0x1]   ;;  %s142_s12 = smov 32   ;;  %v113_v12 = vld [vmem:[%s207_s0 + $0x3] sm:$0x1]  }
   0x7   :  { %v114_v13 = vld [vmem:[%s207_s0 + $0x2] sm:$0x1]   ;;  %s143_s17 = smov 24   ;;  %s144_s18 = smov 16   ;;  %v115_v14 = vld [vmem:[%s207_s0 + $0x1] sm:$0x1]  }
   0x8   :  { %s145_s21 = smov 8   ;;  %v2_v15 = vld [vmem:[%s207_s0] sm:$0x1]   ;;  %vm27_vm4 = vcmask 851712   ;;  %vm33_vm5 = vcmask 786112   ;;  %vm39_vm6 = vcmask 720512  }
   0x9   :  { %4 = vst.msk [vmem:[#allocation0] sm:$0x1] %vm3_vm0, %v2_v15   ;;  %vm45_vm7 = vcmask 654912   ;;  %vm51_vm8 = vcmask 589312   ;;  %vm57_vm9 = vcmask 523712   ;;  %vm63_vm10 = vcmask 458112  }
   0xa   :  { %13 = vrot.lane.b32.xlu0 %v102_v3, %s134_s19  ;;  %25 = vrot.lane.b32.xlu1 %v104_v4, %s135_s20  ;;  %vm69_vm11 = vcmask 392512   ;;  %vm75_vm12 = vcmask 326912   ;;  %vm81_vm13 = vcmask 261312   ;;  %vm87_vm14 = vcmask 195712  }
   0xb   :  { %37 = vrot.lane.b32.xlu2 %v106_v5, %s136_s23  ;;  %vm93_vm15 = vcmask 130112  }
  0x12   :  { %43 = vrot.lane.b32.xlu0 %v107_v6, %s137_s28  ;;  %49 = vrot.lane.b32.xlu1 %v108_v7, %s138_s29 }
  0x13   :  { %55 = vrot.lane.b32.xlu2 %v109_v8, %s139_s3 }
  0x1a   :  { %61 = vrot.lane.b32.xlu0 %v110_v9, %s140_s8  ;;  %67 = vrot.lane.b32.xlu1 %v111_v10, %s141_s9 }
  0x1b   :  { %73 = vrot.lane.b32.xlu2 %v112_v11, %s142_s12 }
  0x22   :  { %79 = vrot.lane.b32.xlu0 %v113_v12, %s143_s17  ;;  %85 = vrot.lane.b32.xlu1 %v114_v13, %s144_s18 }
  0x23   :  { %91 = vrot.lane.b32.xlu2 %v115_v14, %s145_s21 }
  0x5d   :  { %v32_v16 = vpop.permute.xlu2 %31  }
  0x65   :  { %v38_v17 = vpop.permute.xlu2 %37  }
  0x6d   :  { %v56_v18 = vpop.permute.xlu2 %55  }
  0x74   :  { %v8_v19 = vpop.permute.xlu0 %7   ;;  %v20_v20 = vpop.permute.xlu1 %19  }
  0x75   :  { %10 = vst.msk [vmem:[#allocation0] sm:$0x1] %vm9_vm1, %v8_v19   ;;  %v74_v21 = vpop.permute.xlu2 %73  }
  0x7c   :  { %v14_v22 = vpop.permute.xlu0 %13   ;;  %v26_v23 = vpop.permute.xlu1 %25  }
  0x7d   :  { %16 = vst.msk [vmem:[#allocation0] sm:$0x1] %vm15_vm2, %v14_v22   ;;  %v92_v24 = vpop.permute.xlu2 %91  }
  0x7e   :  { %22 = vst.msk [vmem:[#allocation0] sm:$0x1] %vm21_vm3, %v20_v20  }
  0x7f   :  { %28 = vst.msk [vmem:[#allocation0] sm:$0x1] %vm27_vm4, %v26_v23  }
  0x80   :  { %34 = vst.msk [vmem:[#allocation0] sm:$0x1] %vm33_vm5, %v32_v16  }
  0x81   :  { %40 = vst.msk [vmem:[#allocation0] sm:$0x1] %vm39_vm6, %v38_v17  }
  0x84   :  { %v44_v25 = vpop.permute.xlu0 %43   ;;  %v50_v26 = vpop.permute.xlu1 %49  }
  0x85   :  { %46 = vst.msk [vmem:[#allocation0] sm:$0x1] %vm45_vm7, %v44_v25  }
  0x86   :  { %52 = vst.msk [vmem:[#allocation0] sm:$0x1] %vm51_vm8, %v50_v26  }
  0x87   :  { %58 = vst.msk [vmem:[#allocation0] sm:$0x1] %vm57_vm9, %v56_v18  }
  0x8c   :  { %v62_v27 = vpop.permute.xlu0 %61   ;;  %v68_v28 = vpop.permute.xlu1 %67  }
  0x8d   :  { %64 = vst.msk [vmem:[#allocation0] sm:$0x1] %vm63_vm10, %v62_v27  }
  0x8e   :  { %70 = vst.msk [vmem:[#allocation0] sm:$0x1] %vm69_vm11, %v68_v28  }
  0x8f   :  { %76 = vst.msk [vmem:[#allocation0] sm:$0x1] %vm75_vm12, %v74_v21  }
  0x94   :  { %v80_v29 = vpop.permute.xlu0 %79   ;;  %v86_v30 = vpop.permute.xlu1 %85  }
  0x95   :  { %82 = vst.msk [vmem:[#allocation0] sm:$0x1] %vm81_vm13, %v80_v29  }
  0x96   :  { %88 = vst.msk [vmem:[#allocation0] sm:$0x1] %vm87_vm14, %v86_v30  }
  0x97   :  { %94 = vst.msk [vmem:[#allocation0] sm:$0x1] %vm93_vm15, %v92_v24  }
  0x9e   :  { %v97_v31 = vld [vmem:[#allocation0] sm:$0x1] }
  0x9f   :  { %100 = vst [vmem:[%s208_s1] sm:$0x1] %v97_v31 }

// kernel: gconv2d_forward.1
= control target key start
LH: loop header
LB: loop body
LE: loop exit
PB: predicated region body
PF: predicated region fallthrough
CT: control target
= control target key end

     0   :  { %s1405_s12 = smov 0   ;;  %s2058_s0 = inlined_call_operand.vmem [shape: f32[4,18,64], index: 0, kind: input, shape index: {}]   ;;  %s2059_s1 = inlined_call_operand.vmem [shape: f32[3,64,128], index: 1, kind: input, shape index: {}]   ;;  %s2060_s2 = inlined_call_operand.vmem [shape: f32[1,128], index: 2, kind: input, shape index: {}]   ;;  %s2061_s3 = inlined_call_operand.vmem [shape: f32[4,16,128], index: 3, kind: output, shape index: {}]  }
   0x1 LB: > { %s1322_s13 = sadd.s32 4294967295, %s1383_s12   ;;  %p1326_p0 = scmp.ge.s32.totalorder %s1383_s12, 1  ;;  %s1383_s12 = sphi %s1405_s12, %s13_s12  }
   0x2   : > { %p139_p1 = scmp.lt.s32.totalorder %s1383_s12, 3 }
   0x4   : > { %p140_p2 = pnand %p1326_p0, %p139_p1 }
   0x5   : > { %s1327_s20 = sshll.u32 (!%p140_p2), %s1322_s13, 1 }
   0x6   : > { %143 = sbr.rel (%p140_p2) target bundleno = 314 (0x13a), region = 32  ;;  %p166_p3 = scmp.lt.s32.totalorder (!%p140_p2), %s1327_s20, 3 }
   0xb   : > { %v194_v0 = vld [vmem:[%s2059_s1 + $0x38] sm:$0xff]  ;;  %v193_v1 = vld [vmem:[%s2059_s1 + $0x30] sm:$0xff]  ;;  %v192_v2 = vld [vmem:[%s2059_s1 + $0x28] sm:$0xff]  ;;  %s2063_s20 = smov (!%p166_p3, %s1327_s20), 3  ;;  %vm195_vm0 = vcmask 523264  }
   0xc   : > { %v1422_v3 = vand.u32 4294901760, %v194_v0  ;;  %v1424_v4 = vand.u32 4294901760, %v193_v1  ;;  %v1426_v5 = vand.u32 4294901760, %v192_v2  ;;  %v191_v6 = vld [vmem:[%s2059_s1 + $0x20] sm:$0xff]  ;;  %v190_v7 = vld [vmem:[%s2059_s1 + $0x18] sm:$0xff]  ;;  %v189_v8 = vld [vmem:[%s2059_s1 + $0x10] sm:$0xff] }
   0xd   : > { %v1437_v9 = vand.u32 4294901760, %v191_v6  ;;  %v1439_v10 = vand.u32 4294901760, %v190_v7  ;;  %v1441_v11 = vand.u32 4294901760, %v189_v8  ;;  %v188_v12 = vld [vmem:[%s2059_s1 + $0x8] sm:$0xff]  ;;  %v187_v13 = vld [vmem:[%s2059_s1] sm:$0xff]  ;;  %s1367_s4 = smul.u32 24, %s2063_s20 }
   0xe   : > { %1351 = vmatpush.msra.mxu2 %v1422_v3  ;;  %v1451_v14 = vsub.f32 %v194_v0, %v1422_v3  ;;  %v1454_v15 = vsub.f32 %v193_v1, %v1424_v4  ;;  %v1457_v16 = vsub.f32 %v192_v2, %v1426_v5  ;;  %v1459_v17 = vand.u32 4294901760, %v188_v12  ;;  %217 = vmatpush.msra.mxu0 %v1422_v3  ;;  %s1350_s18 = sshll.u32 %s2063_s20, 4 }
   0xf   : > { %v1463_v18 = vsub.f32 %v191_v6, %v1437_v9  ;;  %v1466_v19 = vsub.f32 %v190_v7, %v1439_v10  ;;  %v1471_v20 = vsub.f32 %v189_v8, %v1441_v11  ;;  %v1477_v24 = vand.u32 4294901760, %v187_v13  ;;  %s1500_s7 = scalar_lea.vmem %s2058_s0, %s1367_s4  ;;  %v1339_v7 = vld [vmem:[%s2059_s1 + $0x78] sm:$0xff]  ;;  %s2039_s22 = scalar_lea.vmem %s2061_s3, %s1350_s18 }
  0x10   : > { %1352 = vmatpush.msra.mxu2 %v1424_v4  ;;  %v275_v21 = vand.u32 4294901760, %v1451_v14  ;;  %v281_v22 = vand.u32 4294901760, %v1454_v15  ;;  %v287_v23 = vand.u32 4294901760, %v1457_v16  ;;  %219 = vmatpush.msra.mxu0 %v1424_v4  ;;  %v1483_v26 = vsub.f32 %v188_v12, %v1459_v17  ;;  %v185_v35 = vld [vmem:[%s1500_s7 + $0x18] sm:$0xff]  ;;  %v186_v37 = vld [vmem:[%s1500_s7 + $0x20] sm:$0xff]  ;;  %v184_v48 = vld [vmem:[%s1500_s7 + $0x8] sm:$0xff] }
  0x11   : > { %v293_v25 = vand.u32 4294901760, %v1463_v18  ;;  %v299_v30 = vand.u32 4294901760, %v1466_v19  ;;  %v305_v31 = vand.u32 4294901760, %v1471_v20  ;;  %v1510_v36 = vsub.f32 %v187_v13, %v1477_v24  ;;  %v183_v38 = vld [vmem:[%s1500_s7] sm:$0xff] }
  0x12   : > { %1353 = vmatpush.msra.mxu2 %v1426_v5  ;;  %v276_v27 = vsub.f32 %v1451_v14, %v275_v21  ;;  %v282_v28 = vsub.f32 %v1454_v15, %v281_v22  ;;  %v288_v29 = vsub.f32 %v1457_v16, %v287_v23  ;;  %221 = vmatpush.msra.mxu0 %v1426_v5  ;;  %v203_v39 = vsel %vm195_vm0, %v185_v35, 0 }
  0x13   : > { %v294_v34 = vsub.f32 %v1463_v18, %v293_v25  ;;  %v311_v40 = vand.u32 4294901760, %v1483_v26  ;;  %v300_v42 = vsub.f32 %v1466_v19, %v299_v30  ;;  %v1520_v43 = vand.u32 4294901760, %v203_v39 }
  0x14   : > { %1354 = vmatpush.msra.mxu2 %v1437_v9  ;;  %v277_v32 = vand.u32 4294901760, %v276_v27  ;;  %v283_v33 = vand.u32 4294901760, %v282_v28  ;;  %223 = vmatpush.msra.mxu0 %v1437_v9  ;;  %v289_v41 = vand.u32 4294901760, %v288_v29  ;;  %v206_v44 = vsel %vm195_vm0, %v186_v37, 0  ;;  %v1338_v28 = vld [vmem:[%s2059_s1 + $0x70] sm:$0xff] }
  0x15   : > { %v306_v45 = vsub.f32 %v1471_v20, %v305_v31  ;;  %v1527_v46 = vand.u32 4294901760, %v206_v44  ;;  %v197_v47 = vsel %vm195_vm0, %v183_v38, 0  ;;  %v295_v49 = vand.u32 4294901760, %v294_v34  ;;  %v1337_v34 = vld [vmem:[%s2059_s1 + $0x68] sm:$0xff] }
  0x16   : > { %1359 = vmatpush.msra.mxu3 %v277_v32  ;;  %1355 = vmatpush.msra.mxu2 %v1439_v10  ;;  %v1533_v50 = vsub.f32 %v203_v39, %v1520_v43  ;;  %v317_v51 = vand.u32 4294901760, %v1510_v36  ;;  %v1536_v52 = vand.u32 4294901760, %v197_v47  ;;  %v312_v53 = vsub.f32 %v1483_v26, %v311_v40 }
  0x17   : > { %278 = vmatpush.msra.mxu1 %v277_v32  ;;  %225 = vmatpush.msra.mxu0 %v1439_v10  ;;  %v1542_v54 = vsub.f32 %v206_v44, %v1527_v46  ;;  %v301_v55 = vand.u32 4294901760, %v300_v42  ;;  %v200_v58 = vsel %vm195_vm0, %v184_v48, 0  ;;  %v307_v59 = vand.u32 4294901760, %v306_v45 }
  0x18   : > { %1360 = vmatpush.msra.mxu3 %v283_v33  ;;  %1356 = vmatpush.msra.mxu2 %v1441_v11  ;;  %v250_v56 = vand.u32 4294901760, %v1533_v50  ;;  %v1548_v57 = vsub.f32 %v197_v47, %v1536_v52  ;;  %v318_v61 = vsub.f32 %v1510_v36, %v317_v51  ;;  %v1562_v0 = vand.u32 4294901760, %v200_v58 }
  0x19   : > { %284 = vmatpush.msra.mxu1 %v283_v33  ;;  %227 = vmatpush.msra.mxu0 %v1441_v11  ;;  %v258_v62 = vand.u32 4294901760, %v1542_v54  ;;  %v313_v2 = vand.u32 4294901760, %v312_v53  ;;  %v1582_v29 = vand.u32 4294901760, %v1339_v7  ;;  %v1587_v33 = vand.u32 4294901760, %v1338_v28 }
  0x1a   : > { %1361 = vmatpush.msra.mxu3 %v289_v41  ;;  %1357 = vmatpush.msra.mxu2 %v1459_v17  ;;  %v251_v60 = vsub.f32 %v1533_v50, %v250_v56  ;;  %v234_v63 = vand.u32 4294901760, %v1548_v57  ;;  %v319_v8 = vand.u32 4294901760, %v318_v61  ;;  %v1577_v27 = vsub.f32 %v200_v58, %v1562_v0 }
  0x1b   : > { %290 = vmatpush.msra.mxu1 %v289_v41  ;;  %229 = vmatpush.msra.mxu0 %v1459_v17  ;;  %v259_v12 = vsub.f32 %v1542_v54, %v258_v62  ;;  %v1597_v37 = vsub.f32 %v1339_v7, %v1582_v29  ;;  %v1608_v38 = vsub.f32 %v1338_v28, %v1587_v33  ;;  %v1335_v41 = vld [vmem:[%s2059_s1 + $0x58] sm:$0xff] }
  0x1c   : > { %1362 = vmatpush.msra.mxu3 %v295_v49  ;;  %1358 = vmatpush.msra.mxu2 %v1477_v24  ;;  %v252_v1 = vand.u32 4294901760, %v251_v60  ;;  %v235_v6 = vsub.f32 %v1548_v57, %v234_v63  ;;  %v242_v35 = vand.u32 4294901760, %v1577_v27 }
  0x1d   : > { %296 = vmatpush.msra.mxu1 %v295_v49  ;;  %231 = vmatpush.msra.mxu0 %v1477_v24  ;;  %v260_v32 = vand.u32 4294901760, %v259_v12  ;;  %v634_v42 = vand.u32 4294901760, %v1597_v37  ;;  %v640_v45 = vand.u32 4294901760, %v1608_v38 }
  0x1e   : > { %348 = vmatpush.msrb.mxu2 %v1451_v14  ;;  %1363 = vmatpush.msra.mxu3 %v301_v55  ;;  %v236_v13 = vand.u32 4294901760, %v235_v6  ;;  %v1601_v14 = vand.u32 4294901760, %v1337_v34  ;;  %v243_v39 = vsub.f32 %v1577_v27, %v242_v35  ;;  %v543_v6 = vld [vmem:[%s1500_s7 + $0x9] sm:$0xff] }
  0x1f   : > { %302 = vmatpush.msra.mxu1 %v301_v55  ;;  %253 = vmatmul.f32.vlgmr.msra.gmra.mxu2 %v252_v1  ;;  %v1347_v1 = vld [vmem:[%s2059_s1 + $0xb8] sm:$0xff]  ;;  %v559_v28 = vsel %vm195_vm0, %v543_v6, 0 }
  0x20   : > { %351 = vmatpush.msrb.mxu2 %v1454_v15  ;;  %1364 = vmatpush.msra.mxu3 %v307_v59  ;;  %v1633_v15 = vand.u32 4294901760, %v1335_v41  ;;  %v1738_v7 = vand.u32 4294901760, %v1347_v1 }
  0x21   : > { %308 = vmatpush.msra.mxu1 %v307_v59  ;;  %237 = vmatmul.f32.vlgmr.msra.gmra.mxu0 %v236_v13 }
  0x22   : > { %354 = vmatpush.msrb.mxu2 %v1457_v16  ;;  %1365 = vmatpush.msra.mxu3 %v313_v2  ;;  %v635_v16 = vsub.f32 %v1597_v37, %v634_v42  ;;  %v1663_v48 = vsub.f32 %v1335_v41, %v1633_v15  ;;  %v1766_v41 = vand.u32 4294901760, %v559_v28 }
  0x23   : > { %314 = vmatpush.msra.mxu1 %v313_v2  ;;  %451 = vmatpush.msrb.mxu0 %v275_v21  ;;  %v1336_v21 = vld [vmem:[%s2059_s1 + $0x60] sm:$0xff] }
  0x24   : > { %357 = vmatpush.msrb.mxu2 %v1463_v18  ;;  %1366 = vmatpush.msra.mxu3 %v319_v8  ;;  %v1622_v44 = vand.u32 4294901760, %v1336_v21  ;;  %v1333_v18 = vld [vmem:[%s2059_s1 + $0x48] sm:$0xff]  ;;  %v636_v49 = vand.u32 4294901760, %v635_v16  ;;  %v544_v16 = vld [vmem:[%s1500_s7 + $0x19] sm:$0xff] }
  0x25   : > { %330 = vmatmul.f32.vlgmr.msra.gmra.mxu3 %v1520_v43  ;;  %320 = vmatpush.msra.mxu1 %v319_v8  ;;  %v1673_v55 = vand.u32 4294901760, %v1333_v18 }
  0x26   : > { %360 = vmatpush.msrb.mxu2 %v1466_v19  ;;  %400 = vmatpush.msrb.mxu3 %v1422_v3 }
  0x27   : > { %322 = vmatmul.f32.vlgmr.msra.gmra.mxu1 %v1536_v52  ;;  %261 = vmatmul.f32.gmra.mxu2 %v260_v32  ;;  %v1756_v32 = vsub.f32 %v1347_v1, %v1738_v7 }
  0x28   : > { %363 = vmatpush.msrb.mxu2 %v1471_v20  ;;  %402 = vmatpush.msrb.mxu3 %v1424_v4  ;;  %v1698_v20 = vsub.f32 %v1333_v18, %v1673_v55 }
  0x29   : > { %506 = vmatpush.msrb.mxu1 %v1422_v3  ;;  %455 = vmatpush.msrb.mxu0 %v281_v22  ;;  %v1627_v3 = vsub.f32 %v1337_v34, %v1601_v14  ;;  %v1334_v22 = vld [vmem:[%s2059_s1 + $0x50] sm:$0xff] }
  0x2a   : > { %366 = vmatpush.msrb.mxu2 %v1483_v26  ;;  %404 = vmatpush.msrb.mxu3 %v1426_v5 }
  0x2b   : > { %508 = vmatpush.msrb.mxu1 %v1424_v4  ;;  %459 = vmatpush.msrb.mxu0 %v287_v23  ;;  %v244_v4 = vand.u32 4294901760, %v243_v39  ;;  %v1647_v23 = vsub.f32 %v1336_v21, %v1622_v44  ;;  %v646_v47 = vand.u32 4294901760, %v1627_v3 }
  0x2c   : > { %369 = vmatpush.msrb.mxu2 %v1510_v36  ;;  %406 = vmatpush.msrb.mxu3 %v1437_v9 }
  0x2d   : > { %334 = vmatmul.f32.gmra.mxu3 %v1527_v46  ;;  %510 = vmatpush.msrb.mxu1 %v1426_v5  ;;  %v1652_v5 = vand.u32 4294901760, %v1334_v22  ;;  %v652_v53 = vand.u32 4294901760, %v1647_v23  ;;  %v647_v58 = vsub.f32 %v1627_v3, %v646_v47 }
  0x2e   : > { %408 = vmatpush.msrb.mxu3 %v1439_v10  ;;  %463 = vmatpush.msrb.mxu0 %v293_v25  ;;  %v641_v25 = vsub.f32 %v1608_v38, %v640_v45 }
  0x2f   : > { %576 = vmatpush.msra.mxu2 %v1582_v29  ;;  %512 = vmatpush.msrb.mxu1 %v1437_v9  ;;  %v1332_v9 = vld [vmem:[%s2059_s1 + $0x40] sm:$0xff]  ;;  %v1681_v59 = vsub.f32 %v1334_v22, %v1652_v5 }
  0x30   : > { %372 = vmatmul.f32.vlgmr.msrb.gmra.mxu2 %v1548_v57  ;;  %410 = vmatpush.msrb.mxu3 %v1441_v11  ;;  %v642_v19 = vand.u32 4294901760, %v641_v25  ;;  %v1687_v60 = vand.u32 4294901760, %v1332_v9  ;;  %v648_v57 = vand.u32 4294901760, %v647_v58  ;;  %v562_v58 = vsel %vm195_vm0, %v544_v16, 0 }
  0x31   : > { %245 = vmatmul.f32.gmra.mxu0 %v244_v4  ;;  %326 = vmatmul.f32.gmra.mxu1 %v1562_v0  ;;  %v664_v61 = vand.u32 4294901760, %v1681_v59  ;;  %v1345_v4 = vld [vmem:[%s2059_s1 + $0xa8] sm:$0xff] }
  0x32   : > { %412 = vmatpush.msrb.mxu3 %v1459_v17  ;;  %467 = vmatpush.msrb.mxu0 %v299_v30  ;;  %v658_v30 = vand.u32 4294901760, %v1663_v48  ;;  %v1709_v26 = vsub.f32 %v1332_v9, %v1687_v60  ;;  %v1780_v18 = vand.u32 4294901760, %v1345_v4 }
  0x33   : > { %514 = vmatpush.msrb.mxu1 %v1439_v10  ;;  %578 = vmatpush.msra.mxu2 %v1587_v33  ;;  %v653_v10 = vsub.f32 %v1647_v23, %v652_v53  ;;  %v665_v36 = vsub.f32 %v1681_v59, %v664_v61 }
  0x34   : > { %414 = vmatpush.msrb.mxu3 %v1477_v24  ;;  %471 = vmatpush.msrb.mxu0 %v305_v31  ;;  %v542_v31 = vld [vmem:[%s1500_s7 + $0x1] sm:$0xff]  ;;  %v1793_v9 = vsub.f32 %v1345_v4, %v1780_v18 }
  0x35   : > { %418 = vmatmul.f32.vlgmr.msrb.gmra.mxu3 %v234_v63  ;;  %516 = vmatpush.msrb.mxu1 %v1441_v11  ;;  %v659_v11 = vsub.f32 %v1663_v48, %v658_v30  ;;  %v670_v63 = vand.u32 4294901760, %v1698_v20  ;;  %v666_v8 = vand.u32 4294901760, %v665_v36  ;;  %v1342_v36 = vld [vmem:[%s2059_s1 + $0x90] sm:$0xff] }
  0x36   : > { %637 = vmatpush.msra.mxu3 %v636_v49  ;;  %475 = vmatpush.msrb.mxu0 %v311_v40  ;;  %v654_v40 = vand.u32 4294901760, %v653_v10  ;;  %v1344_v49 = vld [vmem:[%s2059_s1 + $0xa0] sm:$0xff] }
  0x37   : > { %518 = vmatpush.msrb.mxu1 %v1459_v17  ;;  %580 = vmatpush.msra.mxu2 %v1601_v14  ;;  %v556_v17 = vsel %vm195_vm0, %v542_v31, 0  ;;  %v671_v2 = vsub.f32 %v1698_v20, %v670_v63  ;;  %v1805_v10 = vand.u32 4294901760, %v1344_v49 }
  0x38   : > { %377 = vmatmul.f32.gmra.mxu2 %v1577_v27  ;;  %643 = vmatpush.msra.mxu3 %v642_v19  ;;  %v1346_v27 = vld [vmem:[%s2059_s1 + $0xb0] sm:$0xff] }
  0x39   : > { %479 = vmatpush.msrb.mxu0 %v317_v51  ;;  %520 = vmatpush.msrb.mxu1 %v1477_v24  ;;  %v660_v24 = vand.u32 4294901760, %v659_v11  ;;  %v1724_v51 = vand.u32 4294901760, %v556_v17  ;;  %v1758_v34 = vand.u32 4294901760, %v1346_v27  ;;  %v1819_v11 = vand.u32 4294901760, %v562_v58 }
  0x3a   : > { %481 = vmatmul.f32.vlgmr.msrb.gmra.mxu0 %v1536_v52  ;;  %522 = vmatmul.f32.vlgmr.msrb.gmra.mxu1 %v1536_v52  ;;  %v676_v52 = vand.u32 4294901760, %v1709_v26 }
  0x3b   : > { %649 = vmatpush.msra.mxu3 %v648_v57  ;;  %707 = vmatpush.msra.mxu0 %v1597_v37  ;;  %v1744_v12 = vsub.f32 %v556_v17, %v1724_v51  ;;  %v1769_v22 = vsub.f32 %v1346_v27, %v1758_v34  ;;  %v1005_v37 = vand.u32 4294901760, %v1793_v9 }
  0x3c   : > { %582 = vmatpush.msra.mxu2 %v1622_v44  ;;  %759 = vmatpush.msra.mxu1 %v1582_v29  ;;  %v677_v13 = vsub.f32 %v1709_v26, %v676_v52 }
  0x3d   : > { %424 = vmatmul.f32.gmra.mxu3 %v242_v35  ;;  %710 = vmatpush.msra.mxu0 %v1608_v38  ;;  %v672_v35 = vand.u32 4294901760, %v671_v2  ;;  %v593_v21 = vand.u32 4294901760, %v1744_v12  ;;  %v999_v25 = vand.u32 4294901760, %v1769_v22  ;;  %v1341_v2 = vld [vmem:[%s2059_s1 + $0x88] sm:$0xff] }
  0x3e   : > { %655 = vmatpush.msra.mxu3 %v654_v40  ;;  %584 = vmatpush.msra.mxu2 %v1633_v15  ;;  %v678_v39 = vand.u32 4294901760, %v677_v13  ;;  %v545_v40 = vld [vmem:[%s1500_s7 + $0x21] sm:$0xff]  ;;  %v1870_v13 = vand.u32 4294901760, %v1341_v2 }
  0x3f   : > { %761 = vmatpush.msra.mxu1 %v1587_v33  ;;  %713 = vmatpush.msra.mxu0 %v1627_v3  ;;  %v1855_v3 = vsub.f32 %v562_v58, %v1819_v11  ;;  %v565_v1 = vsel %vm195_vm0, %v545_v40, 0 }
  0x40   : > { %382 = vmatmul.f32.gmra.mxu2 %v1533_v50  ;;  %661 = vmatpush.msra.mxu3 %v660_v24  ;;  %v594_v50 = vsub.f32 %v1744_v12, %v593_v21  ;;  %v1848_v24 = vand.u32 4294901760, %v1342_v36 }
  0x41   : > { %586 = vmatpush.msra.mxu2 %v1652_v5  ;;  %763 = vmatpush.msra.mxu1 %v1601_v14  ;;  %v609_v4 = vand.u32 4294901760, %v1855_v3 }
  0x42   : > { %485 = vmatmul.f32.gmra.mxu0 %v1562_v0  ;;  %526 = vmatmul.f32.gmra.mxu1 %v1562_v0  ;;  %v993_v0 = vand.u32 4294901760, %v1756_v32  ;;  %v595_v31 = vand.u32 4294901760, %v594_v50 }
  0x43   : > { %667 = vmatpush.msra.mxu3 %v666_v8  ;;  %716 = vmatpush.msra.mxu0 %v1647_v23  ;;  %v1868_v8 = vsub.f32 %v1342_v36, %v1848_v24  ;;  %v1340_v23 = vld [vmem:[%s2059_s1 + $0x80] sm:$0xff] }
  0x44   : > { %588 = vmatpush.msra.mxu2 %v1673_v55  ;;  %765 = vmatpush.msra.mxu1 %v1622_v44  ;;  %v994_v19 = vsub.f32 %v1756_v32, %v993_v0 }
  0x45   : > { %430 = vmatmul.f32.gmra.mxu3 %v250_v56  ;;  %719 = vmatpush.msra.mxu0 %v1663_v48  ;;  %v1789_v56 = vsub.f32 %v559_v28, %v1766_v41  ;;  %v1023_v27 = vand.u32 4294901760, %v1868_v8  ;;  %v1881_v28 = vsub.f32 %v1341_v2, %v1870_v13 }
  0x46   : > { %673 = vmatpush.msra.mxu3 %v672_v35  ;;  %590 = vmatpush.msra.mxu2 %v1687_v60  ;;  %v995_v17 = vand.u32 4294901760, %v994_v19  ;;  %v1883_v35 = vand.u32 4294901760, %v1340_v23 }
  0x47   : > { %767 = vmatpush.msra.mxu1 %v1633_v15  ;;  %722 = vmatpush.msra.mxu0 %v1681_v59  ;;  %v601_v57 = vand.u32 4294901760, %v1789_v56  ;;  %v1029_v50 = vand.u32 4294901760, %v1881_v28  ;;  %v1024_v48 = vsub.f32 %v1868_v8, %v1023_v27 }
  0x48   : > { %387 = vmatmul.f32.gmra.mxu2 %v1542_v54  ;;  %679 = vmatpush.msra.mxu3 %v678_v39  ;;  %v1006_v54 = vsub.f32 %v1793_v9, %v1005_v37 }
  0x49   : > { %769 = vmatpush.msra.mxu1 %v1652_v5  ;;  %810 = vmatpush.msrb.mxu2 %v634_v42  ;;  %v1813_v42 = vsub.f32 %v1344_v49, %v1805_v10  ;;  %v1897_v49 = vsub.f32 %v1340_v23, %v1883_v35  ;;  %v1025_v19 = vand.u32 4294901760, %v1024_v48 }
  0x4a   : > { %489 = vmatmul.f32.gmra.mxu0 %v1520_v43  ;;  %530 = vmatmul.f32.gmra.mxu1 %v1520_v43  ;;  %v1000_v43 = vsub.f32 %v1769_v22, %v999_v25 }
  0x4b   : > { %725 = vmatpush.msra.mxu0 %v1698_v20  ;;  %865 = vmatpush.msrb.mxu3 %v1582_v29  ;;  %v1343_v29 = vld [vmem:[%s2059_s1 + $0x98] sm:$0xff]  ;;  %v1011_v38 = vand.u32 4294901760, %v1813_v42  ;;  %v1035_v59 = vand.u32 4294901760, %v1897_v49 }
  0x4c   : > { %771 = vmatpush.msra.mxu1 %v1673_v55  ;;  %814 = vmatpush.msrb.mxu2 %v640_v45  ;;  %v1832_v45 = vand.u32 4294901760, %v1343_v29 }
  0x4d   : > { %436 = vmatmul.f32.gmra.mxu3 %v258_v62  ;;  %728 = vmatpush.msra.mxu0 %v1709_v26  ;;  %v1012_v6 = vsub.f32 %v1813_v42, %v1011_v38 }
  0x4e   : > { %867 = vmatpush.msrb.mxu3 %v1587_v33  ;;  %773 = vmatpush.msra.mxu1 %v1687_v60  ;;  %v1846_v62 = vsub.f32 %v1343_v29, %v1832_v45  ;;  %v602_v33 = vsub.f32 %v1789_v56, %v601_v57 }
  0x4f   : > { %818 = vmatpush.msrb.mxu2 %v646_v47  ;;  %935 = vmatpush.msrb.mxu0 %v1738_v7  ;;  %v1001_v47 = vand.u32 4294901760, %v1000_v43  ;;  %v1013_v16 = vand.u32 4294901760, %v1012_v6 }
  0x50   : > { %596 = vmatmul.f32.vlgmr.msra.gmra.mxu2 %v595_v31  ;;  %869 = vmatpush.msrb.mxu3 %v1601_v14  ;;  %v1017_v14 = vand.u32 4294901760, %v1846_v62  ;;  %v603_v39 = vand.u32 4294901760, %v602_v33 }
  0x51   : > { %822 = vmatpush.msrb.mxu2 %v652_v53  ;;  %996 = vmatpush.msrb.mxu1 %v995_v17  ;;  %v1007_v53 = vand.u32 4294901760, %v1006_v54 }
  0x52   : > { %493 = vmatmul.f32.gmra.mxu0 %v1527_v46  ;;  %534 = vmatmul.f32.gmra.mxu1 %v1527_v46  ;;  %v1888_v46 = vand.u32 4294901760, %v565_v1 }
  0x53   : > { %871 = vmatpush.msrb.mxu3 %v1622_v44  ;;  %937 = vmatpush.msrb.mxu0 %v1758_v34  ;;  %v1018_v44 = vsub.f32 %v1846_v62, %v1017_v14 }
  0x54   : > { %826 = vmatpush.msrb.mxu2 %v658_v30  ;;  %1002 = vmatpush.msrb.mxu1 %v1001_v47  ;;  %v610_v30 = vsub.f32 %v1855_v3, %v609_v4  ;;  %v1910_v58 = vsub.f32 %v565_v1, %v1888_v46 }
  0x55   : > { %681 = vmatmul.f32.vlgmr.msra.gmra.mxu3 %v1724_v51  ;;  %939 = vmatpush.msrb.mxu0 %v1780_v18 }
  0x56   : > { %873 = vmatpush.msrb.mxu3 %v1633_v15  ;;  %830 = vmatpush.msrb.mxu2 %v664_v61  ;;  %v1019_v15 = vand.u32 4294901760, %v1018_v44  ;;  %v1030_v61 = vsub.f32 %v1881_v28, %v1029_v50  ;;  %v617_v20 = vand.u32 4294901760, %v1910_v58 }
  0x57   : > { %1008 = vmatpush.msrb.mxu1 %v1007_v53  ;;  %941 = vmatpush.msrb.mxu0 %v1805_v10 }
  0x58   : > { %604 = vmatmul.f32.gmra.mxu2 %v603_v39  ;;  %875 = vmatpush.msrb.mxu3 %v1652_v5  ;;  %v611_v5 = vand.u32 4294901760, %v610_v30 }
  0x59   : > { %834 = vmatpush.msrb.mxu2 %v670_v63  ;;  %1014 = vmatpush.msrb.mxu1 %v1013_v16  ;;  %v1036_v63 = vsub.f32 %v1897_v49, %v1035_v59 }
  0x5a   : > { %731 = vmatmul.f32.vlgmr.msra.gmra.mxu0 %v1744_v12  ;;  %777 = vmatmul.f32.vlgmr.msra.gmra.mxu1 %v593_v21  ;;  %v1031_v12 = vand.u32 4294901760, %v1030_v61 }
  0x5b   : > { %877 = vmatpush.msrb.mxu3 %v1673_v55  ;;  %943 = vmatpush.msrb.mxu0 %v1832_v45  ;;  %v618_v55 = vsub.f32 %v1910_v58, %v617_v20  ;;  %v1037_v26 = vand.u32 4294901760, %v1036_v63 }
  0x5c   : > { %838 = vmatpush.msrb.mxu2 %v676_v52  ;;  %1020 = vmatpush.msrb.mxu1 %v1019_v15  ;;  %v901_v52 = vld [vmem:[%s1500_s7 + $0x2] sm:$0xff] }
  0x5d   : > { %685 = vmatmul.f32.gmra.mxu3 %v1766_v41  ;;  %945 = vmatpush.msrb.mxu0 %v1848_v24  ;;  %v619_v21 = vand.u32 4294901760, %v618_v55 }
  0x5e   : > { %879 = vmatpush.msrb.mxu3 %v1687_v60  ;;  %1026 = vmatpush.msrb.mxu1 %v1025_v19  ;;  %v915_v60 = vsel %vm195_vm0, %v901_v52, 0 }
  0x5f   : > { %1066 = vmatpush.msra.mxu2 %v1756_v32  ;;  %947 = vmatpush.msrb.mxu0 %v1870_v13  ;;  %v1949_v31 = vand.u32 4294901760, %v915_v60 }
  0x60   : > { %612 = vmatmul.f32.gmra.mxu2 %v611_v5  ;;  %1118 = vmatpush.msra.mxu3 %v1738_v7 }
  0x61   : > { %1032 = vmatpush.msrb.mxu1 %v1031_v12  ;;  %1069 = vmatpush.msra.mxu2 %v1769_v22  ;;  %v1964_v32 = vsub.f32 %v915_v60, %v1949_v31 }
  0x62   : > { %736 = vmatmul.f32.gmra.mxu0 %v1789_v56  ;;  %783 = vmatmul.f32.gmra.mxu1 %v601_v57  ;;  %v902_v56 = vld [vmem:[%s1500_s7 + $0xa] sm:$0xff]  ;;  %v904_v57 = vld [vmem:[%s1500_s7 + $0x22] sm:$0xff] }
  0x63   : > { %949 = vmatpush.msrb.mxu0 %v1883_v35  ;;  %1120 = vmatpush.msra.mxu3 %v1758_v34  ;;  %v924_v29 = vsel %vm195_vm0, %v904_v57, 0 }
  0x64   : > { %1038 = vmatpush.msrb.mxu1 %v1037_v26  ;;  %1072 = vmatpush.msra.mxu2 %v1793_v9 }
  0x65   : > { %689 = vmatmul.f32.gmra.mxu3 %v1819_v11  ;;  %1169 = vmatpush.msra.mxu0 %v993_v0  ;;  %v903_v0 = vld [vmem:[%s1500_s7 + $0x1a] sm:$0xff] }
  0x66   : > { %1122 = vmatpush.msra.mxu3 %v1780_v18  ;;  %1075 = vmatpush.msra.mxu2 %v1813_v42  ;;  %v921_v9 = vsel %vm195_vm0, %v903_v0, 0 }
  0x67   : > { %1224 = vmatpush.msra.mxu1 %v1738_v7  ;;  %1173 = vmatpush.msra.mxu0 %v999_v25  ;;  %v918_v7 = vsel %vm195_vm0, %v902_v56, 0  ;;  %v966_v42 = vand.u32 4294901760, %v921_v9 }
  0x68   : > { %620 = vmatmul.f32.gmra.mxu2 %v619_v21  ;;  %1124 = vmatpush.msra.mxu3 %v1805_v10  ;;  %v958_v22 = vand.u32 4294901760, %v918_v7 }
  0x69   : > { %1078 = vmatpush.msra.mxu2 %v1846_v62  ;;  %1226 = vmatpush.msra.mxu1 %v1758_v34  ;;  %v952_v34 = vand.u32 4294901760, %v1964_v32  ;;  %v967_v43 = vsub.f32 %v921_v9, %v966_v42 }
  0x6a   : > { %741 = vmatmul.f32.gmra.mxu0 %v1855_v3  ;;  %789 = vmatmul.f32.gmra.mxu1 %v609_v4  ;;  %v959_v25 = vsub.f32 %v918_v7, %v958_v22 }
  0x6b   : > { %1126 = vmatpush.msra.mxu3 %v1832_v45  ;;  %1177 = vmatpush.msra.mxu0 %v1005_v37  ;;  %v968_v40 = vand.u32 4294901760, %v967_v43 }
  0x6c   : > { %1081 = vmatpush.msra.mxu2 %v1868_v8  ;;  %1228 = vmatpush.msra.mxu1 %v1780_v18  ;;  %v953_v18 = vsub.f32 %v1964_v32, %v952_v34  ;;  %v960_v37 = vand.u32 4294901760, %v959_v25 }
  0x6d   : > { %693 = vmatmul.f32.gmra.mxu3 %v1888_v46  ;;  %1181 = vmatpush.msra.mxu0 %v1011_v38  ;;  %v974_v38 = vand.u32 4294901760, %v924_v29 }
  0x6e   : > { %1128 = vmatpush.msra.mxu3 %v1848_v24  ;;  %1084 = vmatpush.msra.mxu2 %v1881_v28 }
  0x6f   : > { %1230 = vmatpush.msra.mxu1 %v1805_v10  ;;  %1185 = vmatpush.msra.mxu0 %v1017_v14  ;;  %v954_v10 = vand.u32 4294901760, %v953_v18  ;;  %v975_v36 = vsub.f32 %v924_v29, %v974_v38 }
  0x70   : > { %840 = vmatmul.f32.vlgmr.msrb.gmra.mxu2 %v1724_v51  ;;  %1130 = vmatpush.msra.mxu3 %v1870_v13 }
  0x71   : > { %1087 = vmatpush.msra.mxu2 %v1897_v49  ;;  %1232 = vmatpush.msra.mxu1 %v1832_v45  ;;  %v969_v45 = vsub.f32 %v967_v43, %v968_v40  ;;  %v976_v62 = vand.u32 4294901760, %v975_v36 }
  0x72   : > { %746 = vmatmul.f32.gmra.mxu0 %v1910_v58  ;;  %795 = vmatmul.f32.gmra.mxu1 %v617_v20 }
  0x73   : > { %1132 = vmatpush.msra.mxu3 %v1883_v35  ;;  %1189 = vmatpush.msra.mxu0 %v1023_v27  ;;  %v970_v54 = vand.u32 4294901760, %v969_v45 }
  0x74   : > { %1234 = vmatpush.msra.mxu1 %v1848_v24  ;;  %v977_v24 = vsub.f32 %v975_v36, %v976_v62 }
  0x75   : > { %881 = vmatmul.f32.vlgmr.msrb.gmra.mxu3 %v1724_v51  ;;  %1193 = vmatpush.msra.mxu0 %v1029_v50  ;;  %v961_v51 = vsub.f32 %v959_v25, %v960_v37 }
  0x76   : > { %1236 = vmatpush.msra.mxu1 %v1870_v13 }
  0x77   : > { %1197 = vmatpush.msra.mxu0 %v1035_v59  ;;  %v962_v17 = vand.u32 4294901760, %v961_v51 }
  0x78   : > { %844 = vmatmul.f32.gmra.mxu2 %v1766_v41  ;;  %1238 = vmatpush.msra.mxu1 %v1883_v35 }
  0x7a   : > { %955 = vmatmul.f32.vlgmr.msrb.gmra.mxu0 %v954_v10  ;;  %1040 = vmatmul.f32.vlgmr.msrb.gmra.mxu1 %v1949_v31 }
  0x7d   : > { %885 = vmatmul.f32.gmra.mxu3 %v1766_v41  ;;  %v978_v41 = vand.u32 4294901760, %v977_v24 }
  0x80   : > { %848 = vmatmul.f32.gmra.mxu2 %v1819_v11 }
  0x82   : > { %963 = vmatmul.f32.gmra.mxu0 %v962_v17  ;;  %1044 = vmatmul.f32.gmra.mxu1 %v958_v22 }
  0x85   : > { %889 = vmatmul.f32.gmra.mxu3 %v1819_v11 }
  0x88   : > { %852 = vmatmul.f32.gmra.mxu2 %v1888_v46 }
  0x8a   : > { %971 = vmatmul.f32.gmra.mxu0 %v970_v54  ;;  %1048 = vmatmul.f32.gmra.mxu1 %v966_v42 }
  0x8d   : > { %893 = vmatmul.f32.gmra.mxu3 %v1888_v46 }
  0x90   : > { %1090 = vmatmul.f32.vlgmr.msra.gmra.mxu2 %v1964_v32 }
  0x92   : > { %979 = vmatmul.f32.gmra.mxu0 %v978_v41  ;;  %1052 = vmatmul.f32.gmra.mxu1 %v974_v38 }
  0x95   : > { %1136 = vmatmul.f32.vlgmr.msra.gmra.mxu3 %v952_v34 }
  0x98   : > { %1095 = vmatmul.f32.gmra.mxu2 %v959_v25 }
  0x9a   : > { %1199 = vmatmul.f32.vlgmr.msra.gmra.mxu0 %v1949_v31  ;;  %1240 = vmatmul.f32.vlgmr.msra.gmra.mxu1 %v1949_v31 }
  0x9d   : > { %1142 = vmatmul.f32.gmra.mxu3 %v960_v37 }
  0x9e   : > { %v238_v11 = vpop.f32.mrf.mxu0 }
  0xa0   : > { %1100 = vmatmul.f32.gmra.mxu2 %v967_v43 }
  0xa2   : > { %1203 = vmatmul.f32.gmra.mxu0 %v958_v22  ;;  %1244 = vmatmul.f32.gmra.mxu1 %v958_v22  ;;  %v254_v33 = vpop.f32.mrf.mxu2 }
  0xa4   : > { %v323_v3 = vpop.f32.mrf.mxu1 }
  0xa5   : > { %1148 = vmatmul.f32.gmra.mxu3 %v968_v40  ;;  %v324_v47 = vadd.f32 %v323_v3, %v238_v11 }
  0xa8   : > { %1105 = vmatmul.f32.gmra.mxu2 %v975_v36  ;;  %v331_v1 = vpop.f32.mrf.mxu3 }
  0xa9   : > { %v332_v2 = vadd.f32 %v331_v1, %v254_v33 }
  0xaa   : > { %1207 = vmatmul.f32.gmra.mxu0 %v966_v42  ;;  %1248 = vmatmul.f32.gmra.mxu1 %v966_v42  ;;  %v262_v6 = vpop.f32.mrf.mxu2 }
  0xad   : > { %1154 = vmatmul.f32.gmra.mxu3 %v976_v62 }
  0xae   : > { %v246_v14 = vpop.f32.mrf.mxu0  ;;  %v327_v8 = vpop.f32.mrf.mxu1 }
  0xaf   : > { %v328_v13 = vadd.f32 %v327_v8, %v246_v14 }
  0xb0   : > { %v335_v23 = vpop.f32.mrf.mxu3 }
  0xb1   : > { %v336_v53 = vadd.f32 %v335_v23, %v262_v6 }
  0xb2   : > { %1211 = vmatmul.f32.gmra.mxu0 %v974_v38  ;;  %1252 = vmatmul.f32.gmra.mxu1 %v974_v38 }
  0xb3   : > { %v373_v27 = vpop.f32.mrf.mxu2 }
  0xb4   : > { %v374_v28 = vadd.f32 %v373_v27, %v324_v47 }
  0xb7   : > { %v482_v35 = vpop.f32.mrf.mxu0  ;;  %v523_v39 = vpop.f32.mrf.mxu1 }
  0xb8   : > { %v419_v4 = vpop.f32.mrf.mxu3 }
  0xb9   : > { %v420_v46 = vadd.f32 %v419_v4, %v374_v28 }
  0xbb   : > { %v378_v44 = vpop.f32.mrf.mxu2  ;;  %v483_v16 = vadd.f32 %v482_v35, %v420_v46 }
  0xbc   : > { %v379_v50 = vadd.f32 %v378_v44, %v328_v13  ;;  %v2031_v44 = vld [vmem:[%s2060_s2] ss:$0 sm:$0xff] }
  0xbd   : > { %v2012_v49 = vadd.f32 %v523_v39, %v483_v16 }
  0xbf   : > { %v486_v48 = vpop.f32.mrf.mxu0  ;;  %v527_v30 = vpop.f32.mrf.mxu1 }
  0xc0   : > { %v425_v58 = vpop.f32.mrf.mxu3 }
  0xc1   : > { %v426_v15 = vadd.f32 %v425_v58, %v379_v50 }
  0xc3   : > { %v383_v59 = vpop.f32.mrf.mxu2  ;;  %v487_v61 = vadd.f32 %v486_v48, %v426_v15 }
  0xc4   : > { %v384_v19 = vadd.f32 %v383_v59, %v332_v2 }
  0xc5   : > { %v2014_v5 = vadd.f32 %v527_v30, %v487_v61 }
  0xc7   : > { %v490_v20 = vpop.f32.mrf.mxu0  ;;  %v531_v63 = vpop.f32.mrf.mxu1 }
  0xc8   : > { %v431_v12 = vpop.f32.mrf.mxu3 }
  0xc9   : > { %v432_v55 = vadd.f32 %v431_v12, %v384_v19  ;;  %v538_v19 = vadd.f32 %v2031_v44, %v2012_v49 }
  0xcb   : > { %v388_v26 = vpop.f32.mrf.mxu2  ;;  %v491_v52 = vadd.f32 %v490_v20, %v432_v55 }
  0xcc   : > { %v389_v60 = vadd.f32 %v388_v26, %v336_v53 }
  0xcd   : > { %v2016_v21 = vadd.f32 %v531_v63, %v491_v52 }
  0xcf   : > { %v494_v31 = vpop.f32.mrf.mxu0  ;;  %v535_v56 = vpop.f32.mrf.mxu1 }
  0xd0   : > { %v437_v32 = vpop.f32.mrf.mxu3 }
  0xd1   : > { %v438_v7 = vadd.f32 %v437_v32, %v389_v60 }
  0xd3   : > { %v495_v34 = vadd.f32 %v494_v31, %v438_v7  ;;  %v597_v22 = vpop.f32.mrf.mxu2 }
  0xd5   : > { %v2018_v0 = vadd.f32 %v535_v56, %v495_v34 }
  0xd7   : > { %v732_v18 = vpop.f32.mrf.mxu0  ;;  %v778_v25 = vpop.f32.mrf.mxu1 }
  0xd8   : > { %v682_v9 = vpop.f32.mrf.mxu3 }
  0xd9   : > { %v683_v13 = vadd.f32 %v682_v9, %v597_v22  ;;  %v539_v9 = vadd.f32 %v2031_v44, %v2014_v5 }
  0xdb   : > { %v605_v10 = vpop.f32.mrf.mxu2  ;;  %v733_v28 = vadd.f32 %v732_v18, %v683_v13  ;;  %v540_v13 = vadd.f32 %v2031_v44, %v2016_v21  ;;  %v541_v21 = vadd.f32 %v2031_v44, %v2018_v0 }
  0xdd   : > { %v779_v39 = vadd.f32 %v778_v25, %v733_v28 }
  0xdf   : > { %v737_v37 = vpop.f32.mrf.mxu0  ;;  %v784_v42 = vpop.f32.mrf.mxu1 }
  0xe0   : > { %v686_v57 = vpop.f32.mrf.mxu3 }
  0xe1   : > { %v687_v4 = vadd.f32 %v686_v57, %v605_v10 }
  0xe3   : > { %v613_v51 = vpop.f32.mrf.mxu2  ;;  %v738_v15 = vadd.f32 %v737_v37, %v687_v4 }
  0xe5   : > { %v785_v55 = vadd.f32 %v784_v42, %v738_v15 }
  0xe7   : > { %v742_v43 = vpop.f32.mrf.mxu0  ;;  %v790_v29 = vpop.f32.mrf.mxu1 }
  0xe8   : > { %v690_v17 = vpop.f32.mrf.mxu3 }
  0xe9   : > { %v691_v12 = vadd.f32 %v690_v17, %v613_v51 }
  0xeb   : > { %v621_v40 = vpop.f32.mrf.mxu2  ;;  %v743_v49 = vadd.f32 %v742_v43, %v691_v12 }
  0xed   : > { %v791_v42 = vadd.f32 %v790_v29, %v743_v49 }
  0xef   : > { %v2020_v38 = vpop.f32.mrf.mxu0  ;;  %v2022_v45 = vpop.f32.mrf.mxu1 }
  0xf0   : > { %v694_v36 = vpop.f32.mrf.mxu3 }
  0xf1   : > { %v695_v57 = vadd.f32 %v694_v36, %v621_v40 }
  0xf3   : > { %v841_v54 = vpop.f32.mrf.mxu2 }
  0xf4   : > { %v842_v16 = vadd.f32 %v841_v54, %v779_v39 }
  0xf7   : > { %v956_v62 = vpop.f32.mrf.mxu0  ;;  %v1041_v24 = vpop.f32.mrf.mxu1 }
  0xf8   : > { %v882_v41 = vpop.f32.mrf.mxu3  ;;  %v1042_v46 = vadd.f32 %v1041_v24, %v956_v62 }
  0xf9   : > { %v883_v59 = vadd.f32 %v882_v41, %v842_v16 }
  0xfb   : > { %v845_v11 = vpop.f32.mrf.mxu2  ;;  %v897_v26 = vadd.f32 %v883_v59, %v538_v19 }
  0xfc   : > { %v846_v31 = vadd.f32 %v845_v11, %v785_v55 }
  0xff   : > { %v964_v33 = vpop.f32.mrf.mxu0  ;;  %v1045_v3 = vpop.f32.mrf.mxu1 }
 0x100   : > { %v886_v47 = vpop.f32.mrf.mxu3  ;;  %v1046_v52 = vadd.f32 %v1045_v3, %v964_v33  ;;  %v748_v3 = vadd.f32 %v2020_v38, %v695_v57 }
 0x101   : > { %v887_v18 = vadd.f32 %v886_v47, %v846_v31 }
 0x102   : > { %v797_v36 = vadd.f32 %v2022_v45, %v748_v3 }
 0x103   : > { %v849_v1 = vpop.f32.mrf.mxu2  ;;  %v898_v51 = vadd.f32 %v887_v18, %v539_v9 }
 0x104   : > { %v850_v62 = vadd.f32 %v849_v1, %v791_v42 }
 0x107   : > { %v972_v2 = vpop.f32.mrf.mxu0  ;;  %v1049_v6 = vpop.f32.mrf.mxu1 }
 0x108   : > { %v890_v14 = vpop.f32.mrf.mxu3  ;;  %v1050_v17 = vadd.f32 %v1049_v6, %v972_v2 }
 0x109   : > { %v891_v47 = vadd.f32 %v890_v14, %v850_v62 }
 0x10b   : > { %v2024_v8 = vpop.f32.mrf.mxu2  ;;  %v899_v2 = vadd.f32 %v891_v47, %v540_v13 }
 0x10c   : > { %v854_v28 = vadd.f32 %v2024_v8, %v797_v36 }
 0x10f   : > { %v980_v23 = vpop.f32.mrf.mxu0  ;;  %v1053_v53 = vpop.f32.mrf.mxu1 }
 0x110   : > { %v2026_v27 = vpop.f32.mrf.mxu3  ;;  %v1054_v1 = vadd.f32 %v1053_v53, %v980_v23 }
 0x111   : > { %v895_v4 = vadd.f32 %v2026_v27, %v854_v28 }
 0x113   : > { %v1091_v35 = vpop.f32.mrf.mxu2  ;;  %v900_v45 = vadd.f32 %v895_v4, %v541_v21 }
 0x114   : > { %v1092_v50 = vadd.f32 %v1091_v35, %v1042_v46 }
 0x117   : > { %v1200_v48 = vpop.f32.mrf.mxu0  ;;  %v1241_v30 = vpop.f32.mrf.mxu1 }
 0x118   : > { %v1137_v58 = vpop.f32.mrf.mxu3 }
 0x119   : > { %v1138_v61 = vadd.f32 %v1137_v58, %v1092_v50 }
 0x11b   : > { %v1096_v20 = vpop.f32.mrf.mxu2  ;;  %v1201_v63 = vadd.f32 %v1200_v48, %v1138_v61 }
 0x11c   : > { %v1097_v56 = vadd.f32 %v1096_v20, %v1046_v52 }
 0x11d   : > { %v1242_v60 = vadd.f32 %v1241_v30, %v1201_v63 }
 0x11f   : > { %v1256_v32 = vadd.f32 %v1242_v60, %v897_v26  ;;  %v1204_v7 = vpop.f32.mrf.mxu0  ;;  %v1245_v34 = vpop.f32.mrf.mxu1 }
 0x120   : > { %v1143_v22 = vpop.f32.mrf.mxu3 }
 0x121   : > { %1260 = vst [vmem:[%s2039_s22] sm:$0xff] %v1256_v32  ;;  %v1144_v25 = vadd.f32 %v1143_v22, %v1097_v56 }
 0x123   : > { %v1101_v10 = vpop.f32.mrf.mxu2  ;;  %v1205_v37 = vadd.f32 %v1204_v7, %v1144_v25 }
 0x124   : > { %v1102_v24 = vadd.f32 %v1101_v10, %v1050_v17 }
 0x125   : > { %v1246_v54 = vadd.f32 %v1245_v34, %v1205_v37 }
 0x127   : > { %v1257_v41 = vadd.f32 %v1246_v54, %v898_v51  ;;  %v1208_v11 = vpop.f32.mrf.mxu0  ;;  %v1249_v33 = vpop.f32.mrf.mxu1 }
 0x128   : > { %v1149_v43 = vpop.f32.mrf.mxu3 }
 0x129   : > { %1261 = vst [vmem:[%s2039_s22 + $0x8] sm:$0xff] %v1257_v41  ;;  %v1150_v5 = vadd.f32 %v1149_v43, %v1102_v24 }
 0x12b   : > { %v1209_v29 = vadd.f32 %v1208_v11, %v1150_v5  ;;  %v1106_v40 = vpop.f32.mrf.mxu2 }
 0x12c   : > { %v1107_v35 = vadd.f32 %v1106_v40, %v1054_v1 }
 0x12d   : > { %v1250_v6 = vadd.f32 %v1249_v33, %v1209_v29 }
 0x12f   : > { %v1258_v39 = vadd.f32 %v1250_v6, %v899_v2  ;;  %v1212_v14 = vpop.f32.mrf.mxu0  ;;  %v1253_v16 = vpop.f32.mrf.mxu1 }
 0x130   : > { %v1155_v38 = vpop.f32.mrf.mxu3 }
 0x131   : > { %1262 = vst [vmem:[%s2039_s22 + $0x10] sm:$0xff] %v1258_v39  ;;  %v1156_v46 = vadd.f32 %v1155_v38, %v1107_v35 }
 0x133   : > { %v1213_v50 = vadd.f32 %v1212_v14, %v1156_v46 }
 0x135   : > { %v1254_v48 = vadd.f32 %v1253_v16, %v1213_v50 }
 0x137   : > { %v1259_v23 = vadd.f32 %v1254_v48, %v900_v45 }
 0x139   : > { %1263 = vst [vmem:[%s2039_s22 + $0x18] sm:$0xff] %v1259_v23 }
 0x13a PF: > { %s13_s12 = sadd.s32 1, %s1383_s12  }
 0x13b   : > { %p10_p4 = scmp.ge.s32.totalorder %s13_s12, 4  }
 0x13d   :  { %12 = sbr.rel (!%p10_p4) target bundleno = 1 (0x1), region = 64 }

</bundles_post_ra>
